<compile_context>
chip_gen: v7x
topology: tpu7x:2x2x1
jax: 0.10.0
libtpu: 0.0.40
codegen_flags: <defaults>
</compile_context>

<pallas_src>
import jax
import jax.numpy as jnp
from jax.experimental import pallas as pl
from jax.experimental.pallas import tpu as pltpu


def _round_up(n, m):
    return ((n + m - 1) // m) * m


def _choose_tile_b(batch):
    """Batch-tile size: tight for small batches, large (but >=2 grid steps) for big ones."""
    if batch <= 256:
        return max(8, _round_up(batch, 8))
    # Large batches: big tiles amortize the ~0.35us per-step pipeline overhead,
    # but keep at least 2 grid steps so v7x's two TensorCores both get work.
    return min(512, _round_up((batch + 1) // 2, 8))


def critic_kernel(x_ref, w1_ref, b1_ref, w2_ref, b2_ref, w3_ref, b3_ref, o_ref):
    x = x_ref[...]                                     # (tile_b, in_dim), unpadded lanes

    # fc1 + ReLU  (MXU matmul, VPU bias-add / max)
    h1 = jnp.dot(x, w1_ref[...], preferred_element_type=jnp.float32) + b1_ref[...]
    h1 = jnp.maximum(h1, 0.0)

    # fc2 + ReLU
    h2 = jnp.dot(h1, w2_ref[...], preferred_element_type=jnp.float32) + b2_ref[...]
    h2 = jnp.maximum(h2, 0.0)

    # fc3 (no activation).  w3 is lane-padded to 128 for the MXU, but only the
    # real output columns are biased and stored -> ~16x less output HBM traffic.
    out_dim = o_ref.shape[-1]
    out = jnp.dot(h2, w3_ref[...], preferred_element_type=jnp.float32)
    o_ref[...] = (out[:, :out_dim] + b3_ref[...]).astype(o_ref.dtype)


@jax.jit
def critic_forward(x, prepared):
    """x: (B, input_dim) float32.  `prepared`: output of prepare_params() (padded once)."""
    w1, b1 = prepared["w1"], prepared["b1"]
    w2, b2 = prepared["w2"], prepared["b2"]
    w3, b3 = prepared["w3"], prepared["b3"]

    B, in_dim = x.shape
    hid_p = w1.shape[1]          # hidden, padded to a multiple of 128 (at prep time)
    out_p = w3.shape[1]          # output, padded to a multiple of 128 (at prep time)
    out_dim = b3.shape[1]        # real output width (b3 kept unpadded)

    tile_b = _choose_tile_b(B)
    b_p = _round_up(B, tile_b)

    # Only the batch axis of x may need padding (input lanes stay unpadded).
    xp = x if b_p == B else jnp.pad(x, ((0, b_p - B), (0, 0)))

    grid = (b_p // tile_b,)

    def batch_spec(shape):
        return pl.BlockSpec(shape, lambda i: (i, 0))

    def resident_spec(shape):
        # Same block index every grid step -> fetched once, VMEM-resident.
        return pl.BlockSpec(shape, lambda i: (0, 0))

    out = pl.pallas_call(
        critic_kernel,
        out_shape=jax.ShapeDtypeStruct((b_p, out_dim), x.dtype),
        grid=grid,
        in_specs=[
            batch_spec((tile_b, in_dim)),    # x tile, pipelined over batch
            resident_spec((in_dim, hid_p)),  # w1 (real in_dim rows, padded hidden cols)
            resident_spec((1, hid_p)),       # b1
            resident_spec((hid_p, hid_p)),   # w2
            resident_spec((1, hid_p)),       # b2
            resident_spec((hid_p, out_p)),   # w3 (lane-padded to 128 for the MXU)
            resident_spec((1, out_dim)),     # b3 (real output width)
        ],
        out_specs=batch_spec((tile_b, out_dim)),
        compiler_params=pltpu.CompilerParams(
            dimension_semantics=("parallel",),
        ),
    )(xp, w1, b1, w2, b2, w3, b3)

    return out if b_p == B else out[:B]


def prepare_params(params):
    """One-time layout prep — keep OUT of the per-call hot path.

    Weights are stored transposed as (in, out) so the kernel computes
    y = x @ W + b on the MXU.  Hidden dims and w3's columns are zero-padded to
    multiples of 128 (zero rows/cols contribute nothing, so results are exact);
    w1's rows and b3 keep their real widths (in_dim / out_dim).
    """
    w1, b1 = params["w1"], params["b1"]
    w2, b2 = params["w2"], params["b2"]
    w3, b3 = params["w3"], params["b3"]
    hidden = w1.shape[1]
    out_dim = w3.shape[1]
    hid_p = _round_up(hidden, 128)
    out_p = _round_up(out_dim, 128)
    return {
        "w1": jnp.pad(w1, ((0, 0), (0, hid_p - hidden))),
        "b1": jnp.pad(b1, ((0, 0), (0, hid_p - hidden))),
        "w2": jnp.pad(w2, ((0, hid_p - hidden), (0, hid_p - hidden))),
        "b2": jnp.pad(b2, ((0, 0), (0, hid_p - hidden))),
        "w3": jnp.pad(w3, ((0, hid_p - hidden), (0, out_p - out_dim))),
        "b3": b3,  # unpadded: carries the true output width into the wrapper
    }


def init_params(key, input_dim, output_dim, hidden_dim=256, dtype=jnp.float32):
    """Deterministic synthetic init. Weights are stored transposed: (in, out)."""
    k1, k2, k3, k4, k5, k6 = jax.random.split(key, 6)

    def lin(kw, kb, fan_in, fan_out):
        # simple uniform init similar in spirit to PyTorch's default Linear init
        bound = 1.0 / jnp.sqrt(fan_in)
        w = jax.random.uniform(kw, (fan_in, fan_out), dtype, -bound, bound)
        b = jax.random.uniform(kb, (1, fan_out), dtype, -bound, bound)
        return w, b

    w1, b1 = lin(k1, k2, input_dim, hidden_dim)
    w2, b2 = lin(k3, k4, hidden_dim, hidden_dim)
    w3, b3 = lin(k5, k6, hidden_dim, output_dim)
    return {"w1": w1, "b1": b1, "w2": w2, "b2": b2, "w3": w3, "b3": b3}


def critic_forward_ref(x, p):
    """Pure-JAX reference matching PyTorch semantics."""
    h1 = jnp.maximum(x @ p["w1"] + p["b1"], 0.0)
    h2 = jnp.maximum(h1 @ p["w2"] + p["b2"], 0.0)
    return h2 @ p["w3"] + p["b3"]


if __name__ == "__main__":
    # Small shapes consistent with the module's forward:
    #   batch=8, input_dim=32, hidden_dim=256 (module default), output_dim=8
    batch, input_dim, hidden_dim, output_dim = 8, 32, 256, 8

    key = jax.random.PRNGKey(0)
    kx, kp = jax.random.split(key)
    x = jax.random.normal(kx, (batch, input_dim), dtype=jnp.float32)
    params = init_params(kp, input_dim, output_dim, hidden_dim)
    prepared = prepare_params(params)   # one-time padding, NOT in the hot path

    out = jax.block_until_ready(critic_forward(x, prepared))
    ref = critic_forward_ref(x, params)
    assert out.shape == (batch, output_dim)
    assert jnp.allclose(out, ref, atol=1e-4, rtol=1e-4), "mismatch vs JAX reference"

    # Non-multiple-of-8 batch exercises the batch-pad + slice-back path.
    x_odd = jax.random.normal(kx, (10, input_dim), dtype=jnp.float32)
    out_odd = jax.block_until_ready(critic_forward(x_odd, prepared))
    assert out_odd.shape == (10, output_dim)
    assert jnp.allclose(out_odd, critic_forward_ref(x_odd, params), atol=1e-4, rtol=1e-4)

    # Multi-tile batch: tile_b=512 -> 2 grid steps ("parallel" axis feeds both
    # v7x TensorCores) and confirms the pipelined grid path.
    big_b = 1024
    xb = jax.random.normal(kx, (big_b, input_dim), dtype=jnp.float32)
    out_b = jax.block_until_ready(critic_forward(xb, prepared))
    assert out_b.shape == (big_b, output_dim)
    assert jnp.allclose(out_b, critic_forward_ref(xb, params), atol=1e-4, rtol=1e-4)

    print("KERNEL_OK")
</pallas_src>

<mosaic_0001>
module attributes {stable_mosaic.version = 11 : i64} {
  func.func @critic_kernel(%arg0: i32, %arg1: memref<8x32xf32, #tpu.memory_space<vmem>>, %arg2: memref<32x256xf32, #tpu.memory_space<vmem>>, %arg3: memref<1x256xf32, #tpu.memory_space<vmem>>, %arg4: memref<256x256xf32, #tpu.memory_space<vmem>>, %arg5: memref<1x256xf32, #tpu.memory_space<vmem>>, %arg6: memref<256x128xf32, #tpu.memory_space<vmem>>, %arg7: memref<1x8xf32, #tpu.memory_space<vmem>>, %arg8: memref<8x8xf32, #tpu.memory_space<vmem>>) attributes {dimension_semantics = [#tpu.dimension_semantics<parallel>], iteration_bounds = array<i64: 1>, scalar_prefetch = 0 : i64, scratch_operands = 0 : i64, tpu.core_type = #tpu.core_type<tc>, window_params = [{transform_indices = @transform_0, window_bounds = array<i64: 8, 32>}, {pipeline_mode = #tpu.pipeline_mode<synchronous>, transform_indices = @transform_1, window_bounds = array<i64: 32, 256>}, {pipeline_mode = #tpu.pipeline_mode<synchronous>, transform_indices = @transform_2, window_bounds = array<i64: 1, 256>}, {pipeline_mode = #tpu.pipeline_mode<synchronous>, transform_indices = @transform_3, window_bounds = array<i64: 256, 256>}, {pipeline_mode = #tpu.pipeline_mode<synchronous>, transform_indices = @transform_4, window_bounds = array<i64: 1, 256>}, {pipeline_mode = #tpu.pipeline_mode<synchronous>, transform_indices = @transform_5, window_bounds = array<i64: 256, 128>}, {pipeline_mode = #tpu.pipeline_mode<synchronous>, transform_indices = @transform_6, window_bounds = array<i64: 1, 8>}, {transform_indices = @transform_7, window_bounds = array<i64: 8, 8>}]} {
    %c0 = arith.constant 0 : index
    %c0_0 = arith.constant 0 : index
    %0 = vector.load %arg1[%c0, %c0_0] : memref<8x32xf32, #tpu.memory_space<vmem>>, vector<8x32xf32>
    %c0_1 = arith.constant 0 : index
    %c0_2 = arith.constant 0 : index
    %1 = vector.load %arg2[%c0_1, %c0_2] : memref<32x256xf32, #tpu.memory_space<vmem>>, vector<32x256xf32>
    %cst = arith.constant dense<0.000000e+00> : vector<8x256xf32>
    %2 = tpu.matmul %0, %1, %cst {dimension_numbers = #tpu.dot_dimension_numbers<[1], [0], [0], [1], [0, 0, 1, 1], [], []>} : vector<8x32xf32>, vector<32x256xf32>, vector<8x256xf32> -> vector<8x256xf32>
    %c0_3 = arith.constant 0 : index
    %c0_4 = arith.constant 0 : index
    %3 = vector.load %arg3[%c0_3, %c0_4] : memref<1x256xf32, #tpu.memory_space<vmem>>, vector<1x256xf32>
    %4 = vector.broadcast %3 : vector<1x256xf32> to vector<8x256xf32>
    %5 = arith.addf %2, %4 : vector<8x256xf32>
    %cst_5 = arith.constant 0.000000e+00 : f32
    %6 = vector.broadcast %cst_5 : f32 to vector<8x256xf32>
    %7 = arith.maximumf %5, %6 : vector<8x256xf32>
    %c0_6 = arith.constant 0 : index
    %c0_7 = arith.constant 0 : index
    %8 = vector.load %arg4[%c0_6, %c0_7] : memref<256x256xf32, #tpu.memory_space<vmem>>, vector<256x256xf32>
    %cst_8 = arith.constant dense<0.000000e+00> : vector<8x256xf32>
    %9 = tpu.matmul %7, %8, %cst_8 {dimension_numbers = #tpu.dot_dimension_numbers<[1], [0], [0], [1], [0, 0, 1, 1], [], []>} : vector<8x256xf32>, vector<256x256xf32>, vector<8x256xf32> -> vector<8x256xf32>
    %c0_9 = arith.constant 0 : index
    %c0_10 = arith.constant 0 : index
    %10 = vector.load %arg5[%c0_9, %c0_10] : memref<1x256xf32, #tpu.memory_space<vmem>>, vector<1x256xf32>
    %11 = vector.broadcast %10 : vector<1x256xf32> to vector<8x256xf32>
    %12 = arith.addf %9, %11 : vector<8x256xf32>
    %cst_11 = arith.constant 0.000000e+00 : f32
    %13 = vector.broadcast %cst_11 : f32 to vector<8x256xf32>
    %14 = arith.maximumf %12, %13 : vector<8x256xf32>
    %c0_12 = arith.constant 0 : index
    %c0_13 = arith.constant 0 : index
    %15 = vector.load %arg6[%c0_12, %c0_13] : memref<256x128xf32, #tpu.memory_space<vmem>>, vector<256x128xf32>
    %cst_14 = arith.constant dense<0.000000e+00> : vector<8x128xf32>
    %16 = tpu.matmul %14, %15, %cst_14 {dimension_numbers = #tpu.dot_dimension_numbers<[1], [0], [0], [1], [0, 0, 1, 1], [], []>} : vector<8x256xf32>, vector<256x128xf32>, vector<8x128xf32> -> vector<8x128xf32>
    %17 = vector.extract_strided_slice %16 {offsets = [0, 0], sizes = [8, 8], strides = [1, 1]} : vector<8x128xf32> to vector<8x8xf32>
    %c0_15 = arith.constant 0 : index
    %c0_16 = arith.constant 0 : index
    %18 = vector.load %arg7[%c0_15, %c0_16] : memref<1x8xf32, #tpu.memory_space<vmem>>, vector<1x8xf32>
    %19 = vector.broadcast %18 : vector<1x8xf32> to vector<8x8xf32>
    %20 = arith.addf %17, %19 : vector<8x8xf32>
    %c0_17 = arith.constant 0 : index
    %c0_18 = arith.constant 0 : index
    %21 = vector.load %arg8[%c0_17, %c0_18] : memref<8x8xf32, #tpu.memory_space<vmem>>, vector<8x8xf32>
    tpu.vector_store %arg8[%c0_17, %c0_18], %20 {strides = array<i32>} : memref<8x8xf32, #tpu.memory_space<vmem>>, vector<8x8xf32>,
    return
  }
  func.func @transform_0(%arg0: i32) -> (i32, i32) {
    %c0_i32 = arith.constant 0 : i32
    %c0_i32_0 = arith.constant 0 : i32
    return %arg0, %c0_i32 : i32, i32
  }
  func.func @transform_1(%arg0: i32) -> (i32, i32) {
    %c0_i32 = arith.constant 0 : i32
    %c0_i32_0 = arith.constant 0 : i32
    %c0_i32_1 = arith.constant 0 : i32
    return %c0_i32, %c0_i32_0 : i32, i32
  }
  func.func @transform_2(%arg0: i32) -> (i32, i32) {
    %c0_i32 = arith.constant 0 : i32
    %c0_i32_0 = arith.constant 0 : i32
    %c0_i32_1 = arith.constant 0 : i32
    return %c0_i32, %c0_i32_0 : i32, i32
  }
  func.func @transform_3(%arg0: i32) -> (i32, i32) {
    %c0_i32 = arith.constant 0 : i32
    %c0_i32_0 = arith.constant 0 : i32
    %c0_i32_1 = arith.constant 0 : i32
    return %c0_i32, %c0_i32_0 : i32, i32
  }
  func.func @transform_4(%arg0: i32) -> (i32, i32) {
    %c0_i32 = arith.constant 0 : i32
    %c0_i32_0 = arith.constant 0 : i32
    %c0_i32_1 = arith.constant 0 : i32
    return %c0_i32, %c0_i32_0 : i32, i32
  }
  func.func @transform_5(%arg0: i32) -> (i32, i32) {
    %c0_i32 = arith.constant 0 : i32
    %c0_i32_0 = arith.constant 0 : i32
    %c0_i32_1 = arith.constant 0 : i32
    return %c0_i32, %c0_i32_0 : i32, i32
  }
  func.func @transform_6(%arg0: i32) -> (i32, i32) {
    %c0_i32 = arith.constant 0 : i32
    %c0_i32_0 = arith.constant 0 : i32
    %c0_i32_1 = arith.constant 0 : i32
    return %c0_i32, %c0_i32_0 : i32, i32
  }
  func.func @transform_7(%arg0: i32) -> (i32, i32) {
    %c0_i32 = arith.constant 0 : i32
    %c0_i32_0 = arith.constant 0 : i32
    return %arg0, %c0_i32 : i32, i32
  }
}

</mosaic_0001>

<bundles_post_ra>
// kernel: critic_forward.1
= control target key start
LH: loop header
LB: loop body
LE: loop exit
PB: predicated region body
PF: predicated region fallthrough
CT: control target
= control target key end

     0   :  { %12 = vsyncpa [#allocation3], 0  ;;  %s850_s0 = inlined_call_operand.hbm [shape: f32[8,32], index: 0, kind: input, shape index: {}]   ;;  %s851_s1 = inlined_call_operand.hbm [shape: f32[32,256], index: 1, kind: input, shape index: {}]   ;;  %s852_s2 = inlined_call_operand.vmem [shape: f32[1,256], index: 2, kind: input, shape index: {}]   ;;  %s853_s3 = inlined_call_operand.hbm [shape: f32[256,256], index: 3, kind: input, shape index: {}]   ;;  %s854_s4 = inlined_call_operand.vmem [shape: f32[1,256], index: 4, kind: input, shape index: {}]   ;;  %s855_s5 = inlined_call_operand.hbm [shape: f32[256,128], index: 5, kind: input, shape index: {}]   ;;  %s856_s6 = inlined_call_operand.vmem [shape: f32[1,8], index: 6, kind: input, shape index: {}]   ;;  %s857_s7 = inlined_call_operand.hbm [shape: f32[8,8], index: 7, kind: output, shape index: {}]  }
   0x1   :  { %13 = vsyncpa [#allocation6], 0 }
   0x2   :  { %14 = vsyncpa [#allocation9], 0 }
   0x3   :  { %15 = vsyncpa [#allocation4], 0  ;;  %s725_s24 = smov [#allocation5]   ;;  %s607_s28 = scalar_lea.hbm %s851_s1, 1024 }
   0x4   :  { %s31_s25 = sshll.u32 %s725_s24, 4  ;;  %p608_p0 = scmp.ne.s32.totalorder %s851_s1, %s607_s28  ;;  %s32_s25 = int_to_ptr.vmem [resolvable:$true] %s31_s25 }
   0x5   :  { %p611_p1 = scmp.lt.u32.totalorder %s607_s28, %s851_s1 }
   0x7   :  { %p613_p2 = pnand %p611_p1, %p608_p0 }
   0x9   :  { %616 = shalt.err (!%p613_p2)
}
   0xa   :  { %s617_s10 = scalar_lea.vmem %s32_s25, 1024  ;;  %p622_p4 = scmp.lt.s32.totalorder %s32_s25, %s32_s25 }
   0xb   :  { %p618_p3 = scmp.ne.s32.totalorder %s32_s25, %s617_s10  ;;  %p623_p5 = scmp.lt.s32.totalorder %s617_s10, %s617_s10 }
   0xd   :  { %p624_p6 = por %p623_p5, %p622_p4 }
   0xf   :  { %p625_p7 = pnand %p624_p6, %p618_p3 }
  0x11   :  { %628 = shalt.err (!%p625_p7)
}
  0x12   :  { %s726_s11 = smov 256   ;;  %s727_s12 = smov 16  }
  0x13   :  { %37 = dma.hbm_to_vmem [thread:$0]  %s851_s1, 1024, %s32_s25, [#allocation6], %s726_s11, %s726_s11, %s727_s12  }
  0x14   :  { %s728_s15 = smov [#allocation2]   ;;  %s729_s17 = smov [#allocation7]  }
  0x15   :  { %s22_s16 = sshll.u32 %s728_s15, 4  ;;  %s45_s18 = sshll.u32 %s729_s17, 4  ;;  %s23_s16 = int_to_ptr.vmem [resolvable:$true] %s22_s16  ;;  %s46_s18 = int_to_ptr.vmem [resolvable:$true] %s45_s18 }
  0x16   :  { %s629_s21 = scalar_lea.hbm %s850_s0, 128 }
  0x17   :  { %p630_p8 = scmp.ne.s32.totalorder %s850_s0, %s629_s21  ;;  %p633_p9 = scmp.lt.u32.totalorder %s629_s21, %s850_s0 }
  0x19   :  { %p635_p10 = pnand %p633_p9, %p630_p8 }
  0x1b   :  { %638 = shalt.err (!%p635_p10)
}
  0x1c   :  { %s639_s1 = scalar_lea.vmem %s23_s16, 128  ;;  %p644_p12 = scmp.lt.s32.totalorder %s23_s16, %s23_s16 }
  0x1d   :  { %p640_p11 = scmp.ne.s32.totalorder %s23_s16, %s639_s1  ;;  %p645_p13 = scmp.lt.s32.totalorder %s639_s1, %s639_s1 }
  0x1f   :  { %p646_p0 = por %p645_p13, %p644_p12 }
  0x21   :  { %p647_p1 = pnand %p646_p0, %p640_p11 }
  0x23   :  { %650 = shalt.err (!%p647_p1)
}
  0x24   :  { %25 = dma.hbm_to_vmem [thread:$0]  %s850_s0, 128, %s23_s16, [#allocation3]  }
  0x25   :  { %s651_s30 = scalar_lea.hbm %s853_s3, 8192 }
  0x26   :  { %p652_p2 = scmp.ne.s32.totalorder %s853_s3, %s651_s30  ;;  %p655_p3 = scmp.lt.u32.totalorder %s651_s30, %s853_s3 }
  0x28   :  { %p657_p4 = pnand %p655_p3, %p652_p2 }
  0x2a   :  { %660 = shalt.err (!%p657_p4)
}
  0x2b   :  { %s661_s14 = scalar_lea.vmem %s46_s18, 8192  ;;  %p666_p6 = scmp.lt.s32.totalorder %s46_s18, %s46_s18 }
  0x2c   :  { %p662_p5 = scmp.ne.s32.totalorder %s46_s18, %s661_s14  ;;  %p667_p7 = scmp.lt.s32.totalorder %s661_s14, %s661_s14 }
  0x2e   :  { %p668_p8 = por %p667_p7, %p666_p6 }
  0x30   :  { %p669_p9 = pnand %p668_p8, %p662_p5 }
  0x32   :  { %672 = shalt.err (!%p669_p9)
}
  0x33   :  { %51 = dma.hbm_to_vmem [thread:$0]  %s853_s3, 8192, %s46_s18, [#allocation6], %s726_s11, %s726_s11, %s727_s12  }
  0x34   :  { %s730_s16 = smov [#allocation8]   ;;  %s673_s21 = scalar_lea.hbm %s855_s5, 4096 }
  0x35   :  { %s59_s17 = sshll.u32 %s730_s16, 4  ;;  %p674_p10 = scmp.ne.s32.totalorder %s855_s5, %s673_s21  ;;  %s60_s17 = int_to_ptr.vmem [resolvable:$true] %s59_s17 }
  0x36   :  { %p677_p11 = scmp.lt.u32.totalorder %s673_s21, %s855_s5 }
  0x38   :  { %p679_p12 = pnand %p677_p11, %p674_p10 }
  0x3a   :  { %682 = shalt.err (!%p679_p12)
}
  0x3b   :  { %s683_s1 = scalar_lea.vmem %s60_s17, 4096  ;;  %p688_p0 = scmp.lt.s32.totalorder %s60_s17, %s60_s17 }
  0x3c   :  { %p684_p13 = scmp.ne.s32.totalorder %s60_s17, %s683_s1  ;;  %p689_p1 = scmp.lt.s32.totalorder %s683_s1, %s683_s1 }
  0x3e   :  { %p690_p2 = por %p689_p1, %p688_p0 }
  0x40   :  { %p691_p3 = pnand %p690_p2, %p684_p13 }
  0x42   :  { %694 = shalt.err (!%p691_p3)
}
  0x43   :  { %s731_s3 = smov 128   ;;  %s732_s11 = smov 8  }
  0x44   :  { %65 = dma.hbm_to_vmem [thread:$0]  %s855_s5, 4096, %s60_s17, [#allocation9], %s731_s3, %s731_s3, %s732_s11  }
  0x45   :  { %717 = dma.done.wait [#allocation3], 128  }
  0x46   :  { %718 = vsyncadd [#allocation3], 4294967168 }
  0x47   :  { %719 = dma.done.wait [#allocation6], 9216  }
  0x48   :  { %720 = vsyncadd [#allocation6], 4294958080 }
  0x49   :  { %721 = dma.done.wait [#allocation9], 4096  }
  0x4a   :  { %722 = vsyncadd [#allocation9], 4294963200  ;;  %v733_v0 = vmov 0.0   ;;  %v82_v1 = vld [vmem:[#allocation5 + $0x8] sm:$0xff]  ;;  %v84_v2 = vld [vmem:[#allocation5 + $0x18] sm:$0xff]  ;;  %vm101_vm0 = vcmask 261120  }
  0x4b   :  { %169 = vmatprep.mubr.f32.mxu0 %v733_v0  ;;  %v81_v3 = vld [vmem:[#allocation5] sm:$0xff]  ;;  %v493_v4 = vpack.c.bf16 %v84_v2, %v82_v1  ;;  %v83_v5 = vld [vmem:[#allocation5 + $0x10] sm:$0xff]  ;;  %v86_v6 = vld [vmem:[#allocation5 + $0x28] sm:$0xff]  ;;  %s734_s30 = smov [#allocation10]   ;;  %vm437_vm1 = vcmask 64512  }
  0x4c   :  { %v88_v7 = vld [vmem:[#allocation5 + $0x38] sm:$0xff]  ;;  %v495_v8 = vpack.c.bf16 %v83_v5, %v81_v3  ;;  %v85_v10 = vld [vmem:[#allocation5 + $0x20] sm:$0xff]  ;;  %v87_v11 = vld [vmem:[#allocation5 + $0x30] sm:$0xff]  ;;  %s445_s8 = sshll.u32 %s734_s30, 4  ;;  %s446_s8 = int_to_ptr.vmem [resolvable:$true] %s445_s8 }
  0x4d   :  { %v497_v9 = vpack.c.bf16 %v88_v7, %v86_v6  ;;  %494 = vmatprep.subr.bf16.mxu0 %v493_v4  ;;  %v179_v12 = vld [vmem:[#allocation7 + $0x8] sm:$0xff]  ;;  %v181_v13 = vld [vmem:[#allocation7 + $0x18] sm:$0xff]  ;;  %v178_v14 = vld [vmem:[#allocation7] sm:$0xff]  ;;  %v499_v15 = vpack.c.bf16 %v87_v11, %v85_v10  ;;  %p700_p5 = scmp.lt.s32.totalorder %s446_s8, %s446_s8 }
  0x4e   :  { %496 = vmatpush1.bf16.msra.mxu0 %v495_v8  ;;  %v501_v16 = vpack.c.bf16 %v181_v13, %v179_v12  ;;  %v180_v17 = vld [vmem:[#allocation7 + $0x10] sm:$0xff]  ;;  %v183_v18 = vld [vmem:[#allocation7 + $0x28] sm:$0xff]  ;;  %v185_v19 = vld [vmem:[#allocation7 + $0x38] sm:$0xff] }
  0x4f   :  { %498 = vmatprep.subr.bf16.mxu0 %v497_v9  ;;  %v503_v20 = vpack.c.bf16 %v180_v17, %v178_v14  ;;  %v505_v21 = vpack.c.bf16 %v185_v19, %v183_v18  ;;  %v182_v22 = vld [vmem:[#allocation7 + $0x20] sm:$0xff]  ;;  %v184_v23 = vld [vmem:[#allocation7 + $0x30] sm:$0xff]  ;;  %v187_v24 = vld [vmem:[#allocation7 + $0x48] sm:$0xff] }
  0x50   :  { %502 = vmatprep.subr.bf16.mxu1 %v501_v16  ;;  %v189_v25 = vld [vmem:[#allocation7 + $0x58] sm:$0xff]  ;;  %v507_v26 = vpack.c.bf16 %v184_v23, %v182_v22  ;;  %v186_v29 = vld [vmem:[#allocation7 + $0x40] sm:$0xff]  ;;  %v188_v30 = vld [vmem:[#allocation7 + $0x50] sm:$0xff] }
  0x51   :  { %504 = vmatpush1.bf16.msra.mxu1 %v503_v20  ;;  %v80_v27 = vld [vmem:[#allocation2] sm:$0xff]  ;;  %v509_v28 = vpack.c.bf16 %v189_v25, %v187_v24  ;;  %v191_v31 = vld [vmem:[#allocation7 + $0x68] sm:$0xff]  ;;  %v511_v33 = vpack.c.bf16 %v188_v30, %v186_v29  ;;  %v190_v35 = vld [vmem:[#allocation7 + $0x60] sm:$0xff] }
  0x52   :  { %500 = vmatpush1.bf16.msra.mxu0 %v499_v15  ;;  %506 = vmatprep.subr.bf16.mxu1 %v505_v21  ;;  %v193_v32 = vld [vmem:[#allocation7 + $0x78] sm:$0xff]  ;;  %v192_v36 = vld [vmem:[#allocation7 + $0x70] sm:$0xff]  ;;  %v195_v37 = vld [vmem:[#allocation7 + $0x88] sm:$0xff] }
  0x53   :  { %v513_v34 = vpack.c.bf16 %v193_v32, %v191_v31  ;;  %v197_v38 = vld [vmem:[#allocation7 + $0x98] sm:$0xff]  ;;  %v515_v39 = vpack.c.bf16 %v192_v36, %v190_v35  ;;  %v194_v41 = vld [vmem:[#allocation7 + $0x80] sm:$0xff]  ;;  %v196_v42 = vld [vmem:[#allocation7 + $0x90] sm:$0xff] }
  0x54   :  { %v517_v40 = vpack.c.bf16 %v197_v38, %v195_v37  ;;  %v199_v43 = vld [vmem:[#allocation7 + $0xa8] sm:$0xff]  ;;  %v201_v44 = vld [vmem:[#allocation7 + $0xb8] sm:$0xff]  ;;  %v519_v45 = vpack.c.bf16 %v196_v42, %v194_v41  ;;  %v198_v47 = vld [vmem:[#allocation7 + $0xa0] sm:$0xff] }
  0x55   :  { %456 = vmatmul.mubr.msk.f32.vlgmr.msra.gmra.mrb[0].mxu0 %vm101_vm0, %v80_v27  ;;  %508 = vmatpush1.bf16.msra.mxu1 %v507_v26  ;;  %v521_v46 = vpack.c.bf16 %v201_v44, %v199_v43  ;;  %v200_v48 = vld [vmem:[#allocation7 + $0xb0] sm:$0xff]  ;;  %v203_v49 = vld [vmem:[#allocation7 + $0xc8] sm:$0xff]  ;;  %v205_v50 = vld [vmem:[#allocation7 + $0xd8] sm:$0xff] }
  0x56   :  { %510 = vmatprep.subr.bf16.mxu1 %v509_v28  ;;  %v523_v51 = vpack.c.bf16 %v200_v48, %v198_v47  ;;  %v525_v52 = vpack.c.bf16 %v205_v50, %v203_v49  ;;  %v202_v53 = vld [vmem:[#allocation7 + $0xc0] sm:$0xff]  ;;  %v204_v54 = vld [vmem:[#allocation7 + $0xd0] sm:$0xff]  ;;  %v207_v55 = vld [vmem:[#allocation7 + $0xe8] sm:$0xff] }
  0x57   :  { %v209_v56 = vld [vmem:[#allocation7 + $0xf8] sm:$0xff]  ;;  %v527_v57 = vpack.c.bf16 %v204_v54, %v202_v53  ;;  %v206_v59 = vld [vmem:[#allocation7 + $0xe0] sm:$0xff]  ;;  %v208_v60 = vld [vmem:[#allocation7 + $0xf0] sm:$0xff] }
  0x58   :  { %v529_v58 = vpack.c.bf16 %v209_v56, %v207_v55  ;;  %v211_v61 = vld [vmem:[#allocation7 + $0x108] sm:$0xff]  ;;  %v213_v62 = vld [vmem:[#allocation7 + $0x118] sm:$0xff]  ;;  %v531_v63 = vpack.c.bf16 %v208_v60, %v206_v59  ;;  %v210_v1 = vld [vmem:[#allocation7 + $0x100] sm:$0xff] }
  0x59   :  { %512 = vmatpush1.bf16.msra.mxu1 %v511_v33  ;;  %v533_v0 = vpack.c.bf16 %v213_v62, %v211_v61  ;;  %v212_v2 = vld [vmem:[#allocation7 + $0x110] sm:$0xff]  ;;  %v215_v3 = vld [vmem:[#allocation7 + $0x128] sm:$0xff]  ;;  %v217_v4 = vld [vmem:[#allocation7 + $0x138] sm:$0xff] }
  0x5a   :  { %514 = vmatprep.subr.bf16.mxu1 %v513_v34  ;;  %v535_v5 = vpack.c.bf16 %v212_v2, %v210_v1  ;;  %v537_v6 = vpack.c.bf16 %v217_v4, %v215_v3  ;;  %v214_v7 = vld [vmem:[#allocation7 + $0x120] sm:$0xff]  ;;  %v216_v8 = vld [vmem:[#allocation7 + $0x130] sm:$0xff]  ;;  %v219_v9 = vld [vmem:[#allocation7 + $0x148] sm:$0xff] }
  0x5b   :  { %v221_v10 = vld [vmem:[#allocation7 + $0x158] sm:$0xff]  ;;  %v539_v11 = vpack.c.bf16 %v216_v8, %v214_v7  ;;  %v218_v13 = vld [vmem:[#allocation7 + $0x140] sm:$0xff]  ;;  %v220_v14 = vld [vmem:[#allocation7 + $0x150] sm:$0xff] }
  0x5c   :  { %v541_v12 = vpack.c.bf16 %v221_v10, %v219_v9  ;;  %v223_v15 = vld [vmem:[#allocation7 + $0x168] sm:$0xff]  ;;  %v225_v16 = vld [vmem:[#allocation7 + $0x178] sm:$0xff]  ;;  %v543_v17 = vpack.c.bf16 %v220_v14, %v218_v13  ;;  %v222_v19 = vld [vmem:[#allocation7 + $0x160] sm:$0xff] }
  0x5d   :  { %516 = vmatpush1.bf16.msra.mxu1 %v515_v39  ;;  %v545_v18 = vpack.c.bf16 %v225_v16, %v223_v15  ;;  %v224_v20 = vld [vmem:[#allocation7 + $0x170] sm:$0xff]  ;;  %v227_v21 = vld [vmem:[#allocation7 + $0x188] sm:$0xff]  ;;  %v229_v22 = vld [vmem:[#allocation7 + $0x198] sm:$0xff] }
  0x5e   :  { %518 = vmatprep.subr.bf16.mxu1 %v517_v40  ;;  %v547_v23 = vpack.c.bf16 %v224_v20, %v222_v19  ;;  %v549_v24 = vpack.c.bf16 %v229_v22, %v227_v21  ;;  %v226_v25 = vld [vmem:[#allocation7 + $0x180] sm:$0xff]  ;;  %v228_v26 = vld [vmem:[#allocation7 + $0x190] sm:$0xff]  ;;  %v231_v27 = vld [vmem:[#allocation7 + $0x1a8] sm:$0xff]  ;;  %v91_v21 = vlaneseq }
  0x5f   :  { %v233_v28 = vld [vmem:[#allocation7 + $0x1b8] sm:$0xff]  ;;  %v551_v29 = vpack.c.bf16 %v228_v26, %v226_v25  ;;  %v230_v31 = vld [vmem:[#allocation7 + $0x1a0] sm:$0xff]  ;;  %v232_v32 = vld [vmem:[#allocation7 + $0x1b0] sm:$0xff] }
  0x60   :  { %v553_v30 = vpack.c.bf16 %v233_v28, %v231_v27  ;;  %v235_v33 = vld [vmem:[#allocation7 + $0x1c8] sm:$0xff]  ;;  %v237_v34 = vld [vmem:[#allocation7 + $0x1d8] sm:$0xff]  ;;  %v555_v35 = vpack.c.bf16 %v232_v32, %v230_v31  ;;  %v234_v37 = vld [vmem:[#allocation7 + $0x1c0] sm:$0xff]  ;;  %v92_v22 = vshrl.u32 %v91_v21, 7 }
  0x61   :  { %520 = vmatpush1.bf16.msra.mxu1 %v519_v45  ;;  %v557_v36 = vpack.c.bf16 %v237_v34, %v235_v33  ;;  %v236_v38 = vld [vmem:[#allocation7 + $0x1d0] sm:$0xff]  ;;  %v239_v40 = vld [vmem:[#allocation7 + $0x1e8] sm:$0xff]  ;;  %v241_v41 = vld [vmem:[#allocation7 + $0x1f8] sm:$0xff] }
  0x62   :  { %522 = vmatprep.subr.bf16.mxu1 %v521_v46  ;;  %v559_v39 = vpack.c.bf16 %v236_v38, %v234_v37  ;;  %v561_v42 = vpack.c.bf16 %v241_v41, %v239_v40  ;;  %v238_v43 = vld [vmem:[#allocation7 + $0x1e0] sm:$0xff]  ;;  %v240_v44 = vld [vmem:[#allocation7 + $0x1f0] sm:$0xff]  ;;  %v344_v47 = vld [vmem:[#allocation8 + $0x88] sm:$0xff]  ;;  %v97_v25 = vsub.s32 1, %v92_v22 }
  0x63   :  { %v563_v45 = vpack.c.bf16 %v240_v44, %v238_v43  ;;  %v343_v46 = vld [vmem:[#allocation8 + $0x80] sm:$0xff]  ;;  %v328_v50 = vld [vmem:[#allocation8 + $0x8] sm:$0xff]  ;;  %v329_v55 = vld [vmem:[#allocation8 + $0x10] sm:$0xff] }
  0x64   :  { %v327_v48 = vld [vmem:[#allocation8] sm:$0xff]  ;;  %v565_v49 = vpack.c.bf16 %v344_v47, %v343_v46  ;;  %v330_v56 = vld [vmem:[#allocation8 + $0x18] sm:$0xff]  ;;  %v332_v62 = vld [vmem:[#allocation8 + $0x28] sm:$0xff] }
  0x65   :  { %524 = vmatpush1.bf16.msra.mxu1 %v523_v51  ;;  %v345_v51 = vld [vmem:[#allocation8 + $0x90] sm:$0xff]  ;;  %v567_v53 = vpack.c.bf16 %v328_v50, %v327_v48  ;;  %v571_v59 = vpack.c.bf16 %v330_v56, %v329_v55  ;;  %v331_v61 = vld [vmem:[#allocation8 + $0x20] sm:$0xff]  ;;  %v334_v4 = vld [vmem:[#allocation8 + $0x38] sm:$0xff] }
  0x66   :  { %526 = vmatprep.subr.bf16.mxu1 %v525_v52  ;;  %v346_v52 = vld [vmem:[#allocation8 + $0x98] sm:$0xff]  ;;  %566 = vmatprep.subr.bf16.mxu0 %v565_v49  ;;  %v575_v1 = vpack.c.bf16 %v332_v62, %v331_v61  ;;  %v333_v3 = vld [vmem:[#allocation8 + $0x30] sm:$0xff]  ;;  %v335_v9 = vld [vmem:[#allocation8 + $0x40] sm:$0xff] }
  0x67   :  { %v569_v54 = vpack.c.bf16 %v346_v52, %v345_v51  ;;  %568 = vmatpush3.bf16.msra.mxu0 %v567_v53  ;;  %v579_v7 = vpack.c.bf16 %v334_v4, %v333_v3  ;;  %v336_v10 = vld [vmem:[#allocation8 + $0x48] sm:$0xff]  ;;  %v337_v15 = vld [vmem:[#allocation8 + $0x50] sm:$0xff]  ;;  %v338_v16 = vld [vmem:[#allocation8 + $0x58] sm:$0xff] }
  0x68   :  { %v583_v13 = vpack.c.bf16 %v336_v10, %v335_v9  ;;  %v587_v19 = vpack.c.bf16 %v338_v16, %v337_v15  ;;  %v339_v34 = vld [vmem:[#allocation8 + $0x60] sm:$0xff]  ;;  %v357_v37 = vld [vmem:[#allocation8 + $0xf0] sm:$0xff]  ;;  %v358_v38 = vld [vmem:[#allocation8 + $0xf8] sm:$0xff] }
  0x69   :  { %528 = vmatpush1.bf16.msra.mxu1 %v527_v57  ;;  %v347_v57 = vld [vmem:[#allocation8 + $0xa0] sm:$0xff]  ;;  %570 = vmatprep.subr.bf16.mxu0 %v569_v54  ;;  %v341_v40 = vld [vmem:[#allocation8 + $0x70] sm:$0xff]  ;;  %v342_v41 = vld [vmem:[#allocation8 + $0x78] sm:$0xff] }
  0x6a   :  { %530 = vmatprep.subr.bf16.mxu1 %v529_v58  ;;  %v348_v58 = vld [vmem:[#allocation8 + $0xa8] sm:$0xff]  ;;  %v242_v43 = vld [vmem:[%s854_s4] sm:$0x3]  ;;  %s695_s4 = scalar_lea.vmem %s446_s8, 128 }
  0x6b   :  { %v573_v60 = vpack.c.bf16 %v348_v58, %v347_v57  ;;  %572 = vmatpush3.bf16.msra.mxu0 %v571_v59  ;;  %v457_v54 = vld [vmem:[%s856_s6] ss:$0 sm:$0xff]  ;;  %p696_p4 = scmp.ne.s32.totalorder %s446_s8, %s695_s4  ;;  %p701_p6 = scmp.lt.s32.totalorder %s695_s4, %s695_s4 }
  0x6d   :  { %532 = vmatpush1.bf16.msra.mxu1 %v531_v63  ;;  %v349_v63 = vld [vmem:[#allocation8 + $0xb0] sm:$0xff]  ;;  %574 = vmatprep.subr.bf16.mxu0 %v573_v60  ;;  %p702_p7 = por %p701_p6, %p700_p5 }
  0x6e   :  { %534 = vmatprep.subr.bf16.mxu1 %v533_v0  ;;  %v350_v0 = vld [vmem:[#allocation8 + $0xb8] sm:$0xff] }
  0x6f   :  { %v577_v2 = vpack.c.bf16 %v350_v0, %v349_v63  ;;  %576 = vmatpush3.bf16.msra.mxu0 %v575_v1  ;;  %p703_p8 = pnand %p702_p7, %p696_p4 }
  0x71   :  { %536 = vmatpush1.bf16.msra.mxu1 %v535_v5  ;;  %v351_v5 = vld [vmem:[#allocation8 + $0xc0] sm:$0xff]  ;;  %578 = vmatprep.subr.bf16.mxu0 %v577_v2 }
  0x72   :  { %538 = vmatprep.subr.bf16.mxu1 %v537_v6  ;;  %v352_v6 = vld [vmem:[#allocation8 + $0xc8] sm:$0xff] }
  0x73   :  { %v581_v8 = vpack.c.bf16 %v352_v6, %v351_v5  ;;  %580 = vmatpush3.bf16.msra.mxu0 %v579_v7 }
  0x75   :  { %540 = vmatpush1.bf16.msra.mxu1 %v539_v11  ;;  %v353_v11 = vld [vmem:[#allocation8 + $0xd0] sm:$0xff]  ;;  %582 = vmatprep.subr.bf16.mxu0 %v581_v8 }
  0x76   :  { %542 = vmatprep.subr.bf16.mxu1 %v541_v12  ;;  %v354_v12 = vld [vmem:[#allocation8 + $0xd8] sm:$0xff] }
  0x77   :  { %v585_v14 = vpack.c.bf16 %v354_v12, %v353_v11  ;;  %584 = vmatpush3.bf16.msra.mxu0 %v583_v13 }
  0x79   :  { %544 = vmatpush1.bf16.msra.mxu1 %v543_v17  ;;  %v355_v17 = vld [vmem:[#allocation8 + $0xe0] sm:$0xff]  ;;  %586 = vmatprep.subr.bf16.mxu0 %v585_v14 }
  0x7a   :  { %546 = vmatprep.subr.bf16.mxu1 %v545_v18  ;;  %v356_v18 = vld [vmem:[#allocation8 + $0xe8] sm:$0xff] }
  0x7b   :  { %v589_v20 = vpack.c.bf16 %v356_v18, %v355_v17  ;;  %588 = vmatpush3.bf16.msra.mxu0 %v587_v19 }
  0x7d   :  { %548 = vmatpush1.bf16.msra.mxu1 %v547_v23  ;;  %590 = vmatprep.subr.bf16.mxu0 %v589_v20  ;;  %v93_v23 = vsub.s32 0, %v92_v22 }
  0x7e   :  { %550 = vmatprep.subr.bf16.mxu1 %v549_v24  ;;  %v89_v24 = vld [vmem:[%s852_s2] sm:$0x3] }
  0x7f   :  { %v94_v26 = vrot.slane %v89_v24, %v93_v23  ;;  %v98_v27 = vrot.slane %v89_v24, %v97_v25  ;;  %v247_v44 = vrot.slane %v242_v43, %v93_v23 }
  0x81   :  { %552 = vmatpush1.bf16.msra.mxu1 %v551_v29 }
  0x82   :  { %554 = vmatprep.subr.bf16.mxu1 %v553_v30 }
  0x85   :  { %556 = vmatpush1.bf16.msra.mxu1 %v555_v35  ;;  %v340_v35 = vld [vmem:[#allocation8 + $0x68] sm:$0xff] }
  0x86   :  { %558 = vmatprep.subr.bf16.mxu1 %v557_v36  ;;  %v591_v36 = vpack.c.bf16 %v340_v35, %v339_v34 }
  0x88   :  { %592 = vmatpush3.bf16.msra.mxu0 %v591_v36 }
  0x89   :  { %560 = vmatpush1.bf16.msra.mxu1 %v559_v39  ;;  %v593_v39 = vpack.c.bf16 %v358_v38, %v357_v37 }
  0x8a   :  { %562 = vmatprep.subr.bf16.mxu1 %v561_v42  ;;  %v595_v42 = vpack.c.bf16 %v342_v41, %v341_v40 }
  0x8b   :  { %594 = vmatprep.subr.bf16.mxu0 %v593_v39 }
  0x8c   :  { %596 = vmatpush3.bf16.msra.mxu0 %v595_v42 }
  0x8d   :  { %564 = vmatpush1.bf16.msra.mxu1 %v563_v45  ;;  %v251_v45 = vrot.slane %v242_v43, %v97_v25 }
 0x128   :  { %v171_v28 = vpop.f32.mrb[0].mxu0 }
 0x129   :  { %v172_v29 = vadd.f32 %v171_v28, %v94_v26  ;;  %v173_v30 = vpop.f32.mrb[1].mxu0 }
 0x12a   :  { %v174_v31 = vadd.f32 %v173_v30, %v98_v27 }
 0x12b   :  { %v176_v33 = vmax.f32 %v172_v29, 0.0 }
 0x12c   :  { %v177_v32 = vmax.f32 %v174_v31, 0.0 }
 0x12e   :  { %318 = vmatprep.mubr.f32.mxu1 %v177_v32 }
 0x12f   :  { %319 = vmatmul.mubr.f32.vlgmr.msra.gmra.mrb[0].mxu1 %v176_v33 }
 0x202   :  { %v320_v46 = vpop.f32.mrb[0].mxu1 }
 0x203   :  { %v321_v47 = vadd.f32 %v320_v46, %v247_v44  ;;  %v322_v48 = vpop.f32.mrb[1].mxu1 }
 0x204   :  { %v323_v49 = vadd.f32 %v322_v48, %v251_v45 }
 0x205   :  { %v325_v51 = vmax.f32 %v321_v47, 0.0 }
 0x206   :  { %v326_v50 = vmax.f32 %v323_v49, 0.0 }
 0x208   :  { %423 = vmatprep.mubr.f32.mxu0 %v326_v50 }
 0x209   :  { %424 = vmatmul.mubr.f32.vlgmr.msra.gmra.mrb[2].mxu0 %v325_v51 }
 0x2dc   :  { %v490_v52 = vpop.f32.mrb[2].mxu0 }
 0x2dd   :  { %v491_v53 = vpop.f32.mrb[3].mxu0 }
 0x2de   :  { %v492_v55 = vadd.f32 %v491_v53, %v490_v52 }
 0x2e0   :  { %v436_v56 = vadd.f32 %v492_v55, %v457_v54 }
 0x2e2   :  { %438 = vst.msk [vmem:[#allocation10] sm:$0xff] %vm437_vm1, %v436_v56 }
 0x2e3   :  { %706 = shalt.err (!%p703_p8)
}
 0x2e4   :  { %s707_s13 = scalar_lea.hbm %s857_s7, 128 }
 0x2e5   :  { %p708_p9 = scmp.ne.s32.totalorder %s857_s7, %s707_s13  ;;  %p711_p10 = scmp.lt.u32.totalorder %s707_s13, %s857_s7 }
 0x2e7   :  { %p713_p11 = pnand %p711_p10, %p708_p9 }
 0x2e9   :  { %716 = shalt.err (!%p713_p11)
}
 0x2ea   :  { %448 = dma.vmem_to_hbm [thread:$0]  %s446_s8, 128, %s857_s7, [#allocation4]  }
 0x2eb   :  { %723 = dma.done.wait [#allocation4], 128  }
 0x2ec   :  { %724 = vsyncadd [#allocation4], 4294967168 }
 0x2ed   :  { %452 = vsyncpa [#allocation3], 1 }
 0x2ee   :  { %453 = vsyncpa [#allocation6], 1 }
 0x2ef   :  { %454 = vsyncpa [#allocation9], 1 }
 0x2f0   :  { %455 = vsyncpa [#allocation4], 1 }

</bundles_post_ra>
